<compile_context>
chip_gen: v7x
topology: tpu7x:2x2x1
jax: 0.10.0
libtpu: 0.0.40
codegen_flags: <defaults>
</compile_context>

<pallas_src>
import functools
import math

import jax
import jax.numpy as jnp
from jax.experimental import pallas as pl
from jax.experimental.pallas import tpu as pltpu


# Explicit scoped-VMEM limit: <= v7x's 64 MiB physical; on v5e/v6e (128 MiB physical) this
# could be raised to 64-96 MiB at production sizes.
_VMEM_LIMIT = 48 * 1024 * 1024


# ----------------------------------------------------------------------------
# small helpers
# ----------------------------------------------------------------------------
def _round_up(n, m):
    return ((n + m - 1) // m) * m


def _choose_row_tile(m, cap=512):
    """Row tile: multiple of 8, <= cap; prefer >=2 grid steps when cheap (v7x megacore).

    TODO(synk): on single-TC v5e/v6e the largest tile that fits VMEM is strictly better;
    the halving below only matters for v7x's two TensorCores (negligible cost elsewhere).
    """
    mp = _round_up(m, 8)
    tm = min(cap, mp)
    if tm == mp and mp >= 16:
        tm = _round_up(mp // 2, 8)
    return tm


def _choose_batch_block(batch):
    """Largest divisor of `batch` giving >=2 grid steps on the parallel axis (v7x)."""
    for cand in range(batch // 2, 0, -1):
        if batch % cand == 0:
            return cand
    return 1


_SQRT_2_OVER_PI = math.sqrt(2.0 / math.pi)


def _gelu_tanh(x):
    # tanh-approximate GELU (EUP tanh instead of a long VALU erf polynomial).
    # TODO(synk): ~1e-3 abs deviation from exact-erf nn.GELU(); swap to an erf polynomial
    # if bit-level parity with PyTorch is required.
    return 0.5 * x * (1.0 + jnp.tanh(_SQRT_2_OVER_PI * (x + 0.044715 * x * x * x)))


def _layernorm(x, gamma, beta, eps=1e-5):
    mu = jnp.mean(x, axis=-1, keepdims=True)
    var = jnp.mean((x - mu) ** 2, axis=-1, keepdims=True)
    return (x - mu) * jax.lax.rsqrt(var + eps) * gamma + beta


# ----------------------------------------------------------------------------
# Kernel 1: LayerNorm + Linear (patch embedding), row-tiled parallel grid
# ----------------------------------------------------------------------------
def _ln_linear_kernel(x_ref, g_ref, b_ref, w_ref, bias_ref, o_ref):
    xn = _layernorm(x_ref[...], g_ref[...], b_ref[...])          # f32 statistics
    o_ref[...] = jnp.dot(xn.astype(jnp.bfloat16), w_ref[...],
                         preferred_element_type=jnp.float32) + bias_ref[...]


def ln_linear(x, g, b, w, bias, *, row_tile_cap=512):
    M, K = x.shape
    N = w.shape[1]
    if w.dtype != jnp.bfloat16:
        w = w.astype(jnp.bfloat16)
    tm = _choose_row_tile(M, cap=row_tile_cap)
    Mp = _round_up(M, tm)
    if Mp != M:
        x = jnp.pad(x, ((0, Mp - M), (0, 0)))
    # TODO(synk): at production sizes mark the grid-invariant weight specs
    # pipeline_mode=pl.Buffered(1) (constant tiles do not need double buffering).
    out = pl.pallas_call(
        _ln_linear_kernel,
        out_shape=jax.ShapeDtypeStruct((Mp, N), jnp.float32),
        grid=(Mp // tm,),
        in_specs=[
            pl.BlockSpec((tm, K), lambda i: (i, 0)),
            pl.BlockSpec((1, K), lambda i: (0, 0)),
            pl.BlockSpec((1, K), lambda i: (0, 0)),
            pl.BlockSpec((K, N), lambda i: (0, 0)),
            pl.BlockSpec((1, N), lambda i: (0, 0)),
        ],
        out_specs=pl.BlockSpec((tm, N), lambda i: (i, 0)),
        compiler_params=pltpu.CompilerParams(
            dimension_semantics=("parallel",),
            vmem_limit_bytes=_VMEM_LIMIT),
    )(x, g, b, w, bias)
    return out[:M]


# ----------------------------------------------------------------------------
# Kernel 2: the ENTIRE transformer stack in one pallas_call
#   grid = (B // Bblk, depth); layer axis innermost ("arbitrary"), activation carried in
#   VMEM scratch; stacked per-layer weights selected by the layer index in index_map.
# ----------------------------------------------------------------------------
def _transformer_stack_kernel(x_ref, ln1g_ref, ln1b_ref, wqkv_ref, wo_ref, bo_ref,
                              ln2g_ref, ln2b_ref, w1_ref, b1_ref, w2_ref, b2_ref,
                              o_ref, acc_ref, ctx_ref, *, heads, dim_head, seq_valid):
    layer = pl.program_id(1)
    Bb, S, D = x_ref.shape
    R = Bb * S
    inner = heads * dim_head

    # load activations from HBM only at the first layer; afterwards they live in VMEM.
    @pl.when(layer == 0)
    def _():
        acc_ref[...] = x_ref[...].reshape(R, D)

    x = acc_ref[...]                                              # (R, D) f32

    # --- pre-norm multi-head self-attention ---
    xn = _layernorm(x, ln1g_ref[0], ln1b_ref[0])
    # ONE 2-D QKV matmul; 1/sqrt(dim_head) is pre-folded into the Q weight columns.
    qkv = jnp.dot(xn.astype(jnp.bfloat16), wqkv_ref[0],
                  preferred_element_type=jnp.float32)             # (R, 3*inner)
    qkv_bf = qkv.astype(jnp.bfloat16)

    # key-padding mask, computed in-kernel (no DMA, no block-diagonal bias).
    key_valid = jax.lax.broadcasted_iota(jnp.int32, (1, S), 1) < seq_valid

    # TODO(synk): at production head counts / dim_head this unrolled (batch, head) loop
    # should become a head-batched dot_general (or a grid axis); at H*Bblk=8 tiny tiles
    # the MXU work is identical and this form avoids in-kernel 4-D transposes.
    for b in range(Bb):
        r0 = b * S
        for h in range(heads):
            c0 = h * dim_head
            q = qkv_bf[r0:r0 + S, c0:c0 + dim_head]                       # (S, dh)
            k = qkv_bf[r0:r0 + S, inner + c0:inner + c0 + dim_head]       # (S, dh)
            v = qkv_bf[r0:r0 + S, 2 * inner + c0:2 * inner + c0 + dim_head]
            dots = jax.lax.dot_general(q, k, (((1,), (1,)), ((), ())),
                                       preferred_element_type=jnp.float32)  # (S, S)
            dots = jnp.where(key_valid, dots, -1e30)
            m = jnp.max(dots, axis=-1, keepdims=True)
            e = jnp.exp(dots - m)
            p = e * pl.reciprocal(jnp.sum(e, axis=-1, keepdims=True), approx=True)
            ctx = jnp.dot(p.astype(jnp.bfloat16), v,
                          preferred_element_type=jnp.float32)              # (S, dh)
            ctx_ref[r0:r0 + S, c0:c0 + dim_head] = ctx

    # merged-head output projection: ONE (R, inner) @ (inner, D) matmul.
    attn_out = jnp.dot(ctx_ref[...].astype(jnp.bfloat16), wo_ref[0],
                       preferred_element_type=jnp.float32) + bo_ref[0]
    x = x + attn_out

    # --- pre-norm feed-forward ---
    xn2 = _layernorm(x, ln2g_ref[0], ln2b_ref[0])
    h1 = jnp.dot(xn2.astype(jnp.bfloat16), w1_ref[0],
                 preferred_element_type=jnp.float32) + b1_ref[0]
    h1 = _gelu_tanh(h1)
    ff = jnp.dot(h1.astype(jnp.bfloat16), w2_ref[0],
                 preferred_element_type=jnp.float32) + b2_ref[0]
    acc_ref[...] = x + ff

    # write the batch block back to HBM only after the last layer.
    @pl.when(layer == pl.num_programs(1) - 1)
    def _():
        o_ref[...] = acc_ref[...].reshape(Bb, S, D)


def transformer_stack(x, st, *, heads, dim_head, seq_valid, batch_block):
    B, S, D = x.shape
    depth = st["wqkv"].shape[0]
    inner = heads * dim_head
    Bblk = batch_block if (batch_block >= 1 and B % batch_block == 0) else 1

    def _lspec(arr):
        shape = arr.shape
        return pl.BlockSpec((1,) + shape[1:],
                            lambda bb, l: (l,) + (0,) * (len(shape) - 1))

    kernel = functools.partial(_transformer_stack_kernel, heads=heads,
                               dim_head=dim_head, seq_valid=seq_valid)

    # TODO(synk): at production sizes (dim 768, mlp 3072) add a grid axis over the FF
    # hidden dim (and key blocks for attention) so the working set stays within v7x's
    # 64 MiB VMEM; at this configuration everything fits comfortably.
    return pl.pallas_call(
        kernel,
        out_shape=jax.ShapeDtypeStruct((B, S, D), jnp.float32),
        grid=(B // Bblk, depth),
        in_specs=[
            pl.BlockSpec((Bblk, S, D), lambda bb, l: (bb, 0, 0)),
            _lspec(st["ln1_g"]), _lspec(st["ln1_b"]),
            _lspec(st["wqkv"]), _lspec(st["wo"]), _lspec(st["bo"]),
            _lspec(st["ln2_g"]), _lspec(st["ln2_b"]),
            _lspec(st["w1"]), _lspec(st["b1"]),
            _lspec(st["w2"]), _lspec(st["b2"]),
        ],
        out_specs=pl.BlockSpec((Bblk, S, D), lambda bb, l: (bb, 0, 0)),
        scratch_shapes=[
            pltpu.VMEM((Bblk * S, D), jnp.float32),       # activation carried over layers
            pltpu.VMEM((Bblk * S, inner), jnp.float32),   # merged-head attention context
        ],
        compiler_params=pltpu.CompilerParams(
            dimension_semantics=("parallel", "arbitrary"),
            vmem_limit_bytes=_VMEM_LIMIT),
    )(x, st["ln1_g"], st["ln1_b"], st["wqkv"], st["wo"], st["bo"],
      st["ln2_g"], st["ln2_b"], st["w1"], st["b1"], st["w2"], st["b2"])


# ----------------------------------------------------------------------------
# Plain-JAX glue: shifted patch tokenization, timestep embedding, tiny MLPs
# ----------------------------------------------------------------------------
def shifted_patch_tokens(x, patch_size):
    """x: (B, C, H, W) -> tokens (B, num_patches, patch_size**2 * 5 * C)."""
    B, C, H, W = x.shape
    # F.pad shift order: (1,-1,0,0), (-1,1,0,0), (0,0,1,-1), (0,0,-1,1)
    s_right = jnp.pad(x, ((0, 0), (0, 0), (0, 0), (1, 0)))[..., :W]
    s_left  = jnp.pad(x, ((0, 0), (0, 0), (0, 0), (0, 1)))[..., 1:]
    s_down  = jnp.pad(x, ((0, 0), (0, 0), (1, 0), (0, 0)))[..., :H, :]
    s_up    = jnp.pad(x, ((0, 0), (0, 0), (0, 1), (0, 0)))[..., 1:, :]
    x5 = jnp.concatenate([x, s_right, s_left, s_down, s_up], axis=1)   # (B, 5C, H, W)
    C5 = 5 * C
    P = patch_size
    # 'b c (h p1) (w p2) -> b (h w) (p1 p2 c)'
    t = x5.reshape(B, C5, H // P, P, W // P, P)
    t = jnp.transpose(t, (0, 2, 4, 3, 5, 1))              # (B, h, w, p1, p2, c)
    return t.reshape(B, (H // P) * (W // P), P * P * C5)


def timestep_embedding(timesteps, dim, max_period=10000.0):
    # [cos, sin] ordering, matching the guided-diffusion style timestep_embedding.
    half = dim // 2
    freqs = jnp.exp(-math.log(max_period) * jnp.arange(half, dtype=jnp.float32) / half)
    args = timesteps.astype(jnp.float32)[:, None] * freqs[None, :]
    return jnp.concatenate([jnp.cos(args), jnp.sin(args)], axis=-1)


def time_embed_mlp(t_emb, p):
    # 4-row Linear->SiLU->Linear: intentionally plain XLA (a pallas_call dispatch costs
    # more than this compute; see performance review).
    h = t_emb @ p["te_w1"] + p["te_b1"]
    h = h * jax.nn.sigmoid(h)
    return h @ p["te_w2"] + p["te_b2"]


def mlp_head(x_pool, p):
    # 4-row LayerNorm + Linear classifier head: intentionally plain XLA (same reason).
    xh = _layernorm(x_pool, p["head_ln_g"], p["head_ln_b"])
    return xh @ p["head_w"] + p["head_b"]


# ----------------------------------------------------------------------------
# Parameters (deterministic synthetic init; Linear weights stored (in, out)) and the
# one-time preparation step (bf16 casts, layer stacking, Q-scale folding).
# ----------------------------------------------------------------------------
def init_params(key, *, dim, patch_size, channels, num_patches, depth,
                heads, dim_head, mlp_dim, num_classes):
    patch_dim = patch_size * patch_size * 5 * channels
    inner = heads * dim_head
    keys = iter(jax.random.split(key, 64))

    def nrm(shape, scale=0.02):
        return (scale * jax.random.normal(next(keys), shape)).astype(jnp.float32)

    p = {
        "spt_ln_g": jnp.ones((1, patch_dim), jnp.float32),
        "spt_ln_b": jnp.zeros((1, patch_dim), jnp.float32),
        "spt_w": nrm((patch_dim, dim)),
        "spt_b": jnp.zeros((1, dim), jnp.float32),
        "pos_embedding": nrm((1, num_patches + 1, dim), 1.0),   # torch.randn
        "cls_token": nrm((1, 1, dim), 1.0),                     # torch.randn
        "te_w1": nrm((dim, dim)), "te_b1": jnp.zeros((1, dim), jnp.float32),
        "te_w2": nrm((dim, dim)), "te_b2": jnp.zeros((1, dim), jnp.float32),
        "head_ln_g": jnp.ones((1, dim), jnp.float32),
        "head_ln_b": jnp.zeros((1, dim), jnp.float32),
        "head_w": nrm((dim, num_classes)),
        "head_b": jnp.zeros((1, num_classes), jnp.float32),
        "layers": [],
    }
    for _ in range(depth):
        p["layers"].append({
            "ln1_g": jnp.ones((1, dim), jnp.float32),
            "ln1_b": jnp.zeros((1, dim), jnp.float32),
            "wqkv": nrm((dim, 3 * inner)),
            "wo": nrm((inner, dim)),
            "bo": jnp.zeros((1, dim), jnp.float32),
            "ln2_g": jnp.ones((1, dim), jnp.float32),
            "ln2_b": jnp.zeros((1, dim), jnp.float32),
            "w1": nrm((dim, mlp_dim)), "b1": jnp.zeros((1, mlp_dim), jnp.float32),
            "w2": nrm((mlp_dim, dim)), "b2": jnp.zeros((1, dim), jnp.float32),
        })
    return p


def prepare_params(params, *, heads, dim_head):
    """One-time weight preparation (hoisted out of the forward pass)."""
    inner = heads * dim_head
    scale = dim_head ** -0.5
    layers = params["layers"]

    def stack(name):
        return jnp.stack([lp[name] for lp in layers], axis=0)

    wqkv = stack("wqkv")                                    # (depth, D, 3*inner) f32
    wqkv = wqkv.at[:, :, :inner].multiply(scale)            # fold 1/sqrt(dh) into Q cols

    prepped = {k: v for k, v in params.items() if k != "layers"}
    prepped["spt_w"] = params["spt_w"].astype(jnp.bfloat16)
    prepped["stack"] = {
        "ln1_g": stack("ln1_g"), "ln1_b": stack("ln1_b"),
        "wqkv": wqkv.astype(jnp.bfloat16),
        "wo": stack("wo").astype(jnp.bfloat16),
        "bo": stack("bo"),
        "ln2_g": stack("ln2_g"), "ln2_b": stack("ln2_b"),
        "w1": stack("w1").astype(jnp.bfloat16), "b1": stack("b1"),
        "w2": stack("w2").astype(jnp.bfloat16), "b2": stack("b2"),
    }
    return prepped


# ----------------------------------------------------------------------------
# Full sViT forward (expects prepare_params() output)
# ----------------------------------------------------------------------------
def svit_forward(params, imgs, timestep, *, patch_size, dim, heads, dim_head,
                 num_classes, pool="cls", batch_block=None):
    set_b, b, c, h, w = imgs.shape
    B = set_b * b
    x_img = imgs.reshape(B, c, h, w)

    # shifted patch tokenization (glue) + LayerNorm/Linear patch embedding (Pallas)
    tokens = shifted_patch_tokens(x_img, patch_size)             # (B, N, patch_dim)
    N = tokens.shape[1]
    patch_dim = tokens.shape[2]
    emb = ln_linear(tokens.reshape(B * N, patch_dim),
                    params["spt_ln_g"], params["spt_ln_b"],
                    params["spt_w"], params["spt_b"])            # (B*N, dim)
    x = emb.reshape(B, N, dim)

    # timestep embedding MLP (plain XLA, 4 rows)
    t_emb = timestep_embedding(timestep, dim)                    # (B, dim)
    t_feat = time_embed_mlp(t_emb, params)                       # (B, dim)

    cls = jnp.broadcast_to(params["cls_token"], (B, 1, dim))
    x = jnp.concatenate([cls, x], axis=1)                        # (B, N+1, dim)
    x = x + t_feat[:, None, :]
    x = x + params["pos_embedding"][:, :N + 1]
    # dropout(p=0.0) -> identity

    # pad sequence to a sublane multiple; padded keys are masked inside the kernel so the
    # valid tokens are bit-for-bit unaffected.
    seq_valid = N + 1
    seq_pad = _round_up(seq_valid, 8)
    if seq_pad != seq_valid:
        x = jnp.pad(x, ((0, 0), (0, seq_pad - seq_valid), (0, 0)))

    bblk = batch_block if batch_block is not None else _choose_batch_block(B)

    # transformer: ONE fused Pallas kernel over (batch blocks, depth)
    x = transformer_stack(x, params["stack"], heads=heads, dim_head=dim_head,
                          seq_valid=seq_valid, batch_block=bblk)

    x = x[:, :seq_valid]
    x = jnp.mean(x, axis=1) if pool == "mean" else x[:, 0]       # (B, dim)

    # classifier head (plain XLA, 4 rows)
    logits = mlp_head(x, params)                                 # (B, num_classes)
    logits = logits.reshape(set_b, b, num_classes)
    return jnp.mean(logits, axis=1).reshape(set_b, 1, num_classes)


# ----------------------------------------------------------------------------
if __name__ == "__main__":
    # small config consistent with the module
    image_size, patch_size, channels = 16, 4, 3
    dim, depth, heads, dim_head, mlp_dim, num_classes = 32, 2, 4, 8, 64, 10
    set_b, b = 2, 2
    num_patches = (image_size // patch_size) ** 2

    key = jax.random.PRNGKey(0)
    k_params, k_img, k_t = jax.random.split(key, 3)
    params = init_params(k_params, dim=dim, patch_size=patch_size, channels=channels,
                         num_patches=num_patches, depth=depth, heads=heads,
                         dim_head=dim_head, mlp_dim=mlp_dim, num_classes=num_classes)
    prepped = prepare_params(params, heads=heads, dim_head=dim_head)   # one-time prep

    imgs = jax.random.normal(k_img, (set_b, b, channels, image_size, image_size),
                             dtype=jnp.float32)
    timestep = jnp.arange(set_b * b, dtype=jnp.float32)          # one timestep per image

    out = svit_forward(prepped, imgs, timestep, patch_size=patch_size, dim=dim,
                       heads=heads, dim_head=dim_head, num_classes=num_classes)
    out = jax.block_until_ready(out)
    assert out.shape == (set_b, 1, num_classes), out.shape
    print("KERNEL_OK")
</pallas_src>

<mosaic_0001>
module attributes {stable_mosaic.version = 11 : i64} {
  func.func @_ln_linear_kernel(%arg0: i32, %arg1: memref<32x240xf32, #tpu.memory_space<vmem>>, %arg2: memref<1x240xf32, #tpu.memory_space<vmem>>, %arg3: memref<1x240xf32, #tpu.memory_space<vmem>>, %arg4: memref<240x32xbf16, #tpu.memory_space<vmem>>, %arg5: memref<1x32xf32, #tpu.memory_space<vmem>>, %arg6: memref<32x32xf32, #tpu.memory_space<vmem>>) attributes {dimension_semantics = [#tpu.dimension_semantics<parallel>], iteration_bounds = array<i64: 2>, scalar_prefetch = 0 : i64, scratch_operands = 0 : i64, tpu.core_type = #tpu.core_type<tc>, window_params = [{transform_indices = @transform_0, window_bounds = array<i64: 32, 240>}, {pipeline_mode = #tpu.pipeline_mode<synchronous>, transform_indices = @transform_1, window_bounds = array<i64: 1, 240>}, {pipeline_mode = #tpu.pipeline_mode<synchronous>, transform_indices = @transform_2, window_bounds = array<i64: 1, 240>}, {pipeline_mode = #tpu.pipeline_mode<synchronous>, transform_indices = @transform_3, window_bounds = array<i64: 240, 32>}, {pipeline_mode = #tpu.pipeline_mode<synchronous>, transform_indices = @transform_4, window_bounds = array<i64: 1, 32>}, {transform_indices = @transform_5, window_bounds = array<i64: 32, 32>}]} {
    %c0 = arith.constant 0 : index
    %c0_0 = arith.constant 0 : index
    %0 = vector.load %arg1[%c0, %c0_0] : memref<32x240xf32, #tpu.memory_space<vmem>>, vector<32x240xf32>
    %c0_1 = arith.constant 0 : index
    %c0_2 = arith.constant 0 : index
    %1 = vector.load %arg2[%c0_1, %c0_2] : memref<1x240xf32, #tpu.memory_space<vmem>>, vector<1x240xf32>
    %c0_3 = arith.constant 0 : index
    %c0_4 = arith.constant 0 : index
    %2 = vector.load %arg3[%c0_3, %c0_4] : memref<1x240xf32, #tpu.memory_space<vmem>>, vector<1x240xf32>
    %cst = arith.constant dense<0.000000e+00> : vector<32xf32>
    %3 = vector.multi_reduction <add>, %0, %cst [1] : vector<32x240xf32> to vector<32xf32>
    %4 = vector.shape_cast %3 : vector<32xf32> to vector<32x1xf32>
    %cst_5 = arith.constant 2.400000e+02 : f32
    %5 = vector.broadcast %cst_5 : f32 to vector<32x1xf32>
    %6 = arith.divf %4, %5 : vector<32x1xf32>
    %7 = vector.broadcast %6 : vector<32x1xf32> to vector<32x240xf32>
    %8 = arith.subf %0, %7 : vector<32x240xf32>
    %9 = arith.mulf %8, %8 : vector<32x240xf32>
    %cst_6 = arith.constant dense<0.000000e+00> : vector<32xf32>
    %10 = vector.multi_reduction <add>, %9, %cst_6 [1] : vector<32x240xf32> to vector<32xf32>
    %11 = vector.shape_cast %10 : vector<32xf32> to vector<32x1xf32>
    %cst_7 = arith.constant 2.400000e+02 : f32
    %12 = vector.broadcast %cst_7 : f32 to vector<32x1xf32>
    %13 = arith.divf %11, %12 : vector<32x1xf32>
    %14 = vector.broadcast %6 : vector<32x1xf32> to vector<32x240xf32>
    %15 = arith.subf %0, %14 : vector<32x240xf32>
    %cst_8 = arith.constant 9.99999974E-6 : f32
    %16 = vector.broadcast %cst_8 : f32 to vector<32x1xf32>
    %17 = arith.addf %13, %16 : vector<32x1xf32>
    %18 = math.rsqrt %17 : vector<32x1xf32>
    %19 = vector.broadcast %18 : vector<32x1xf32> to vector<32x240xf32>
    %20 = arith.mulf %15, %19 : vector<32x240xf32>
    %21 = vector.broadcast %1 : vector<1x240xf32> to vector<32x240xf32>
    %22 = arith.mulf %20, %21 : vector<32x240xf32>
    %23 = vector.broadcast %2 : vector<1x240xf32> to vector<32x240xf32>
    %24 = arith.addf %22, %23 : vector<32x240xf32>
    %25 = arith.truncf %24 : vector<32x240xf32> to vector<32x240xbf16>
    %c0_9 = arith.constant 0 : index
    %c0_10 = arith.constant 0 : index
    %26 = vector.load %arg4[%c0_9, %c0_10] : memref<240x32xbf16, #tpu.memory_space<vmem>>, vector<240x32xbf16>
    %cst_11 = arith.constant dense<0.000000e+00> : vector<32x32xf32>
    %27 = tpu.matmul %25, %26, %cst_11 {dimension_numbers = #tpu.dot_dimension_numbers<[1], [0], [0], [1], [0, 0, 1, 1], [], []>} : vector<32x240xbf16>, vector<240x32xbf16>, vector<32x32xf32> -> vector<32x32xf32>
    %c0_12 = arith.constant 0 : index
    %c0_13 = arith.constant 0 : index
    %28 = vector.load %arg5[%c0_12, %c0_13] : memref<1x32xf32, #tpu.memory_space<vmem>>, vector<1x32xf32>
    %29 = vector.broadcast %28 : vector<1x32xf32> to vector<32x32xf32>
    %30 = arith.addf %27, %29 : vector<32x32xf32>
    %c0_14 = arith.constant 0 : index
    %c0_15 = arith.constant 0 : index
    %31 = vector.load %arg6[%c0_14, %c0_15] : memref<32x32xf32, #tpu.memory_space<vmem>>, vector<32x32xf32>
    tpu.vector_store %arg6[%c0_14, %c0_15], %30 {strides = array<i32>} : memref<32x32xf32, #tpu.memory_space<vmem>>, vector<32x32xf32>,
    return
  }
  func.func @transform_0(%arg0: i32) -> (i32, i32) {
    %c0_i32 = arith.constant 0 : i32
    %c0_i32_0 = arith.constant 0 : i32
    return %arg0, %c0_i32 : i32, i32
  }
  func.func @transform_1(%arg0: i32) -> (i32, i32) {
    %c0_i32 = arith.constant 0 : i32
    %c0_i32_0 = arith.constant 0 : i32
    %c0_i32_1 = arith.constant 0 : i32
    return %c0_i32, %c0_i32_0 : i32, i32
  }
  func.func @transform_2(%arg0: i32) -> (i32, i32) {
    %c0_i32 = arith.constant 0 : i32
    %c0_i32_0 = arith.constant 0 : i32
    %c0_i32_1 = arith.constant 0 : i32
    return %c0_i32, %c0_i32_0 : i32, i32
  }
  func.func @transform_3(%arg0: i32) -> (i32, i32) {
    %c0_i32 = arith.constant 0 : i32
    %c0_i32_0 = arith.constant 0 : i32
    %c0_i32_1 = arith.constant 0 : i32
    return %c0_i32, %c0_i32_0 : i32, i32
  }
  func.func @transform_4(%arg0: i32) -> (i32, i32) {
    %c0_i32 = arith.constant 0 : i32
    %c0_i32_0 = arith.constant 0 : i32
    %c0_i32_1 = arith.constant 0 : i32
    return %c0_i32, %c0_i32_0 : i32, i32
  }
  func.func @transform_5(%arg0: i32) -> (i32, i32) {
    %c0_i32 = arith.constant 0 : i32
    %c0_i32_0 = arith.constant 0 : i32
    return %arg0, %c0_i32 : i32, i32
  }
}

</mosaic_0001>

<bundles_post_ra>
// kernel: tpu_custom_call.1
= control target key start
LH: loop header
LB: loop body
LE: loop exit
PB: predicated region body
PF: predicated region fallthrough
CT: control target
= control target key end

     0   :  { %s733_s18 = smov 0   ;;  %s920_s0 = inlined_call_operand.vmem [shape: f32[64,240], index: 0, kind: input, shape index: {}]   ;;  %s921_s1 = inlined_call_operand.vmem [shape: f32[1,240], index: 1, kind: input, shape index: {}]   ;;  %s922_s2 = inlined_call_operand.vmem [shape: f32[1,240], index: 2, kind: input, shape index: {}]   ;;  %s923_s3 = inlined_call_operand.vmem [shape: bf16[240,32], index: 3, kind: input, shape index: {}]   ;;  %s924_s4 = inlined_call_operand.vmem [shape: f32[1,32], index: 4, kind: input, shape index: {}]   ;;  %s925_s5 = inlined_call_operand.vmem [shape: f32[64,32], index: 5, kind: output, shape index: {}]  }
   0x1 LB: > { %s601_s19 = sadd.s32 4294967295, %s700_s18   ;;  %p605_p0 = scmp.ge.s32.totalorder %s700_s18, 1  ;;  %s700_s18 = sphi %s733_s18, %s15_s18  }
   0x2   : > { %p189_p1 = scmp.lt.s32.totalorder %s700_s18, 3 }
   0x4   : > { %p190_p2 = pnand %p605_p0, %p189_p1 }
   0x5   : > { %s606_s20 = sshll.u32 (!%p190_p2), %s601_s19, 2  ;;  %vm242_vm0 = vcmask (!%p190_p2), 916480   ;;  %v671_v16 = vld [vmem:[%s923_s3] sm:$0xff] (!%p190_p2)   ;;  %v702_v17 = vmov (!%p190_p2), 0   ;;  %v672_v18 = vld [vmem:[%s923_s3 + $0x8] sm:$0xff] (!%p190_p2)   ;;  %v673_v19 = vld [vmem:[%s923_s3 + $0x10] sm:$0xff] (!%p190_p2)  }
   0x6   : > { %193 = sbr.rel (%p190_p2) target bundleno = 562 (0x232), region = 40  ;;  %p219_p3 = scmp.lt.s32.totalorder (!%p190_p2), %s606_s20, 7  ;;  %491 = vmatprep.subr.bf16.mxu0 (!%p190_p2), %v702_v17  ;;  %632 = vmatprep.subr.bf16.mxu1 (!%p190_p2), %v702_v17  ;;  %v674_v20 = vld [vmem:[%s923_s3 + $0x18] sm:$0xff] (!%p190_p2)   ;;  %v675_v21 = vld [vmem:[%s923_s3 + $0x20] sm:$0xff] (!%p190_p2)   ;;  %v676_v22 = vld [vmem:[%s923_s3 + $0x28] sm:$0xff] (!%p190_p2)   ;;  %vm540_vm1 = vcmask (!%p190_p2), 261120  }
   0x7   : > { %492 = vmatpush1.bf16.msra.mxu0 (!%p190_p2), %v671_v16  ;;  %647 = vmatpush1.bf16.msra.mxu1 (!%p190_p2), %v671_v16  ;;  %v677_v23 = vld [vmem:[%s923_s3 + $0x30] sm:$0xff] (!%p190_p2)   ;;  %v678_v24 = vld [vmem:[%s923_s3 + $0x38] sm:$0xff] (!%p190_p2)   ;;  %v679_v57 = vld [vmem:[%s923_s3 + $0x40] sm:$0xff] (!%p190_p2)  }
   0x8   : > { %493 = vmatprep.subr.bf16.mxu0 (!%p190_p2), %v702_v17  ;;  %633 = vmatprep.subr.bf16.mxu1 (!%p190_p2), %v702_v17  ;;  %v680_v58 = vld [vmem:[%s923_s3 + $0x48] sm:$0xff] (!%p190_p2)   ;;  %v681_v59 = vld [vmem:[%s923_s3 + $0x50] sm:$0xff] (!%p190_p2)   ;;  %v682_v60 = vld [vmem:[%s923_s3 + $0x58] sm:$0xff] (!%p190_p2)  }
   0x9   : > { %v683_v61 = vld [vmem:[%s923_s3 + $0x60] sm:$0xff] (!%p190_p2)   ;;  %v684_v62 = vld [vmem:[%s923_s3 + $0x68] sm:$0xff] (!%p190_p2)   ;;  %v685_v63 = vld [vmem:[%s923_s3 + $0x70] sm:$0xff] (!%p190_p2)  }
   0xa   : > { %v240_v16 = vld [vmem:[%s921_s1] sm:$0x3] (!%p190_p2) }
   0xb   : > { %494 = vmatpush1.bf16.msra.mxu0 (!%p190_p2), %v672_v18  ;;  %648 = vmatpush1.bf16.msra.mxu1 (!%p190_p2), %v672_v18 }
   0xc   : > { %495 = vmatprep.subr.bf16.mxu0 (!%p190_p2), %v702_v17  ;;  %634 = vmatprep.subr.bf16.mxu1 (!%p190_p2), %v702_v17 }
   0xd   : > { %s927_s20 = smov (!%p219_p3, %s606_s20), 7 }
   0xe   : > { %s631_s21 = sshll.u32 %s927_s20, 4  ;;  %s610_s11 = sshll.u32 %s927_s20, 3 }
   0xf   : > { %s223_s24 = scalar_lea.vmem %s920_s0, %s631_s21  ;;  %496 = vmatpush1.bf16.msra.mxu0 %v673_v19  ;;  %649 = vmatpush1.bf16.msra.mxu1 %v673_v19  ;;  %s229_s16 = scalar_lea.vmem %s925_s5, %s610_s11 }
  0x10   : > { %v747_v0 = vld [vmem:[%s223_s24] sm:$0xff]  ;;  %v749_v1 = vld [vmem:[%s223_s24 + $0x8] sm:$0xff]  ;;  %v757_v5 = vld [vmem:[%s223_s24 + $0x10] sm:$0xff]  ;;  %497 = vmatprep.subr.bf16.mxu0 %v702_v17  ;;  %635 = vmatprep.subr.bf16.mxu1 %v702_v17 }
  0x11   : > { %v751_v2 = vld [vmem:[%s223_s24 + $0x20] sm:$0xff]  ;;  %v243_v3 = vsel %vm242_vm0, %v749_v1, 0.0  ;;  %v755_v4 = vld [vmem:[%s223_s24 + $0x28] sm:$0xff]  ;;  %v759_v6 = vld [vmem:[%s223_s24 + $0x18] sm:$0xff] }
  0x12   : > { %v244_v7 = vadd.f32 %v243_v3, %v747_v0  ;;  %v251_v8 = vsel %vm242_vm0, %v755_v4, 0.0  ;;  %v247_v9 = vsel %vm242_vm0, %v759_v6, 0.0  ;;  %v766_v10 = vld [vmem:[%s223_s24 + $0x30] sm:$0xff]  ;;  %v768_v11 = vld [vmem:[%s223_s24 + $0x38] sm:$0xff]  ;;  %v317_v3 = vlaneseq }
  0x13   : > { %v252_v12 = vadd.f32 %v251_v8, %v751_v2  ;;  %v255_v13 = vsel %vm242_vm0, %v768_v11, 0.0  ;;  %v248_v14 = vadd.f32 %v247_v9, %v757_v5  ;;  %498 = vmatpush1.bf16.msra.mxu0 %v674_v20  ;;  %650 = vmatpush1.bf16.msra.mxu1 %v674_v20  ;;  %v241_v20 = vld [vmem:[%s922_s2] sm:$0x3] }
  0x14   : > { %245 = vadd.xlane.f32.xlu0 %v244_v7  ;;  %v256_v15 = vadd.f32 %v255_v13, %v766_v10  ;;  %499 = vmatprep.subr.bf16.mxu0 %v702_v17 }
  0x15   : > { %253 = vadd.xlane.f32.xlu1 %v252_v12  ;;  %636 = vmatprep.subr.bf16.mxu1 %v702_v17 }
  0x17   : > { %500 = vmatpush1.bf16.msra.mxu0 %v675_v21  ;;  %651 = vmatpush1.bf16.msra.mxu1 %v675_v21 }
  0x18   : > { %249 = vadd.xlane.f32.xlu0 %v248_v14  ;;  %501 = vmatprep.subr.bf16.mxu0 %v702_v17 }
  0x19   : > { %257 = vadd.xlane.f32.xlu1 %v256_v15  ;;  %637 = vmatprep.subr.bf16.mxu1 %v702_v17 }
  0x1b   : > { %502 = vmatpush1.bf16.msra.mxu0 %v676_v22  ;;  %652 = vmatpush1.bf16.msra.mxu1 %v676_v22 }
  0x1c   : > { %503 = vmatprep.subr.bf16.mxu0 %v702_v17  ;;  %638 = vmatprep.subr.bf16.mxu1 %v702_v17 }
  0x1f   : > { %504 = vmatpush1.bf16.msra.mxu0 %v677_v23  ;;  %653 = vmatpush1.bf16.msra.mxu1 %v677_v23 }
  0x20   : > { %505 = vmatprep.subr.bf16.mxu0 %v702_v17  ;;  %639 = vmatprep.subr.bf16.mxu1 %v702_v17 }
  0x23   : > { %506 = vmatpush1.bf16.msra.mxu0 %v678_v24  ;;  %654 = vmatpush1.bf16.msra.mxu1 %v678_v24 }
  0x24   : > { %507 = vmatprep.subr.bf16.mxu0 %v702_v17  ;;  %640 = vmatprep.subr.bf16.mxu1 %v702_v17 }
  0x27   : > { %508 = vmatpush1.bf16.msra.mxu0 %v679_v57  ;;  %655 = vmatpush1.bf16.msra.mxu1 %v679_v57 }
  0x28   : > { %509 = vmatprep.subr.bf16.mxu0 %v702_v17  ;;  %641 = vmatprep.subr.bf16.mxu1 %v702_v17 }
  0x2b   : > { %510 = vmatpush1.bf16.msra.mxu0 %v680_v58  ;;  %656 = vmatpush1.bf16.msra.mxu1 %v680_v58 }
  0x2c   : > { %511 = vmatprep.subr.bf16.mxu0 %v702_v17  ;;  %642 = vmatprep.subr.bf16.mxu1 %v702_v17 }
  0x2f   : > { %512 = vmatpush1.bf16.msra.mxu0 %v681_v59  ;;  %657 = vmatpush1.bf16.msra.mxu1 %v681_v59 }
  0x30   : > { %513 = vmatprep.subr.bf16.mxu0 %v702_v17  ;;  %643 = vmatprep.subr.bf16.mxu1 %v702_v17 }
  0x33   : > { %514 = vmatpush1.bf16.msra.mxu0 %v682_v60  ;;  %658 = vmatpush1.bf16.msra.mxu1 %v682_v60 }
  0x34   : > { %515 = vmatprep.subr.bf16.mxu0 %v702_v17  ;;  %644 = vmatprep.subr.bf16.mxu1 %v702_v17 }
  0x37   : > { %516 = vmatpush1.bf16.msra.mxu0 %v683_v61  ;;  %659 = vmatpush1.bf16.msra.mxu1 %v683_v61 }
  0x38   : > { %517 = vmatprep.subr.bf16.mxu0 %v702_v17  ;;  %645 = vmatprep.subr.bf16.mxu1 %v702_v17 }
  0x3b   : > { %518 = vmatpush1.bf16.msra.mxu0 %v684_v62  ;;  %660 = vmatpush1.bf16.msra.mxu1 %v684_v62 }
  0x3c   : > { %519 = vmatprep.subr.bf16.mxu0 %v702_v17  ;;  %646 = vmatprep.subr.bf16.mxu1 %v702_v17 }
  0x3f   : > { %520 = vmatpush1.bf16.msra.mxu0 %v685_v63  ;;  %661 = vmatpush1.bf16.msra.mxu1 %v685_v63 }
  0xa1   : > { %v246_v25 = vpop.xlane.xlu0 %245 }
  0xa2   : > { %v260_v26 = vmul.f32 0.004166667, %v246_v25  ;;  %v254_v27 = vpop.xlane.xlu1 %253 }
  0xa3   : > { %v262_v28 = vmul.f32 0.004166667, %v254_v27 }
  0xa4   : > { %v818_v29 = vsub.f32 %v747_v0, %v260_v26  ;;  %v821_v30 = vsub.f32 %v749_v1, %v260_v26 }
  0xa5   : > { %v824_v31 = vsub.f32 %v751_v2, %v262_v28  ;;  %v827_v32 = vsub.f32 %v755_v4, %v262_v28  ;;  %v250_v33 = vpop.xlane.xlu0 %249 }
  0xa6   : > { %v261_v34 = vmul.f32 0.004166667, %v250_v33  ;;  %v258_v35 = vpop.xlane.xlu1 %257  ;;  %v272_v36 = vmul.f32 %v818_v29, %v818_v29  ;;  %v273_v37 = vmul.f32 %v821_v30, %v821_v30 }
  0xa7   : > { %v263_v38 = vmul.f32 0.004166667, %v258_v35  ;;  %v276_v39 = vmul.f32 %v824_v31, %v824_v31  ;;  %v277_v40 = vmul.f32 %v827_v32, %v827_v32 }
  0xa8   : > { %v838_v41 = vsub.f32 %v757_v5, %v261_v34  ;;  %v841_v42 = vsub.f32 %v759_v6, %v261_v34  ;;  %v280_v43 = vsel %vm242_vm0, %v273_v37, 0.0 }
  0xa9   : > { %v845_v44 = vsub.f32 %v766_v10, %v263_v38  ;;  %v848_v45 = vsub.f32 %v768_v11, %v263_v38  ;;  %v281_v46 = vadd.f32 %v280_v43, %v272_v36  ;;  %v288_v47 = vsel %vm242_vm0, %v277_v40, 0.0 }
  0xaa   : > { %v274_v48 = vmul.f32 %v838_v41, %v838_v41  ;;  %v275_v49 = vmul.f32 %v841_v42, %v841_v42  ;;  %v289_v50 = vadd.f32 %v288_v47, %v276_v39  ;;  %v318_v10 = vshrl.u32 %v317_v3, 7 }
  0xab   : > { %282 = vadd.xlane.f32.xlu0 %v281_v46  ;;  %v278_v51 = vmul.f32 %v845_v44, %v845_v44  ;;  %v279_v52 = vmul.f32 %v848_v45, %v848_v45 }
  0xac   : > { %v284_v53 = vsel %vm242_vm0, %v275_v49, 0.0  ;;  %v319_v14 = vsub.s32 0, %v318_v10  ;;  %v323_v15 = vsub.s32 1, %v318_v10 }
  0xad   : > { %v285_v54 = vadd.f32 %v284_v53, %v274_v48  ;;  %v292_v55 = vsel %vm242_vm0, %v279_v52, 0.0 }
  0xae   : > { %v293_v56 = vadd.f32 %v292_v55, %v278_v51  ;;  %v320_v18 = vrot.slane %v240_v16, %v319_v14  ;;  %v324_v19 = vrot.slane %v240_v16, %v323_v15  ;;  %v339_v25 = vrot.slane %v241_v20, %v319_v14 }
  0xaf   : > { %290 = vadd.xlane.f32.xlu0 %v289_v50  ;;  %286 = vadd.xlane.f32.xlu1 %v285_v54  ;;  %v343_v26 = vrot.slane %v241_v20, %v323_v15 }
  0xb3   : > { %294 = vadd.xlane.f32.xlu1 %v293_v56 }
 0x138   : > { %v283_v0 = vpop.xlane.xlu0 %282 }
 0x139   : > { %v296_v1 = vmul.f32 0.004166667, %v283_v0 }
 0x13b   : > { %v300_v2 = vadd.f32 1e-05, %v296_v1 }
 0x13c   : > { %v287_v4 = vpop.xlane.xlu1 %286  ;;  %v291_v5 = vpop.xlane.xlu0 %290 }
 0x13d   : > { %686 = vrsqrt.f32 %v300_v2  ;;  %v297_v6 = vmul.f32 0.004166667, %v287_v4  ;;  %v298_v7 = vmul.f32 0.004166667, %v291_v5 }
 0x13f   : > { %v301_v8 = vadd.f32 1e-05, %v297_v6  ;;  %v302_v9 = vadd.f32 1e-05, %v298_v7 }
 0x140   : > { %v295_v11 = vpop.xlane.xlu1 %294 }
 0x141   : > { %688 = vrsqrt.f32 %v301_v8  ;;  %v299_v12 = vmul.f32 0.004166667, %v295_v11 }
 0x142   : > { %690 = vrsqrt.f32 %v302_v9 }
 0x143   : > { %v303_v13 = vadd.f32 1e-05, %v299_v12 }
 0x145   : > { %692 = vrsqrt.f32 %v303_v13 }
 0x147   : > { %v687_v17 = vpop.eup %686 }
 0x148   : > { %v309_v21 = vmul.f32 %v687_v17, %v821_v30  ;;  %v308_v22 = vmul.f32 %v687_v17, %v818_v29 }
 0x14a   : > { %v328_v24 = vmul.f32 %v324_v19, %v309_v21  ;;  %v327_v27 = vmul.f32 %v320_v18, %v308_v22 }
 0x14b   : > { %v689_v23 = vpop.eup %688 }
 0x14c   : > { %v691_v28 = vpop.eup %690  ;;  %v311_v33 = vmul.f32 %v689_v23, %v841_v42  ;;  %v310_v34 = vmul.f32 %v689_v23, %v838_v41  ;;  %v347_v30 = vadd.f32 %v343_v26, %v328_v24  ;;  %v346_v40 = vadd.f32 %v339_v25, %v327_v27 }
 0x14d   : > { %v313_v35 = vmul.f32 %v691_v28, %v827_v32  ;;  %v312_v36 = vmul.f32 %v691_v28, %v824_v31 }
 0x14e   : > { %v330_v37 = vmul.f32 %v324_v19, %v311_v33  ;;  %v329_v38 = vmul.f32 %v320_v18, %v310_v34 }
 0x14f   : > { %v693_v39 = vpop.eup %692  ;;  %v332_v29 = vmul.f32 %v324_v19, %v313_v35  ;;  %v331_v43 = vmul.f32 %v320_v18, %v312_v36 }
 0x150   : > { %v349_v46 = vadd.f32 %v343_v26, %v330_v37  ;;  %v348_v47 = vadd.f32 %v339_v25, %v329_v38  ;;  %v315_v48 = vmul.f32 %v693_v39, %v848_v45  ;;  %v314_v42 = vmul.f32 %v693_v39, %v845_v44  ;;  %v611_v44 = vld [vmem:[%s924_s4] ss:$0 sm:$0xff] }
 0x151   : > { %v351_v31 = vadd.f32 %v343_v26, %v332_v29  ;;  %v350_v52 = vadd.f32 %v339_v25, %v331_v43 }
 0x152   : > { %v355_v49 = vpack.c.bf16 %v349_v46, %v347_v30  ;;  %v354_v41 = vpack.c.bf16 %v348_v47, %v346_v40  ;;  %v334_v50 = vmul.f32 %v324_v19, %v315_v48  ;;  %v333_v32 = vmul.f32 %v320_v18, %v314_v42 }
 0x154   : > { %627 = vmatprep.mubr.msk.bf16.mxu0 %vm242_vm0, %v355_v49  ;;  %v353_v51 = vadd.f32 %v343_v26, %v334_v50  ;;  %v352_v53 = vadd.f32 %v339_v25, %v333_v32 }
 0x155   : > { %524 = vmatmul.mubr.bf16.vlgmr.msra.gmra.mrb[0].mxu0 %v354_v41 }
 0x156   : > { %v357_v54 = vpack.c.bf16 %v353_v51, %v351_v31  ;;  %v356_v55 = vpack.c.bf16 %v352_v53, %v350_v52 }
 0x158   : > { %628 = vmatprep.mubr.msk.bf16.mxu1 %vm242_vm0, %v357_v54 }
 0x159   : > { %532 = vmatmul.mubr.bf16.vlgmr.msra.gmra.mrb[0].mxu1 %v356_v55 }
 0x228   : > { %v525_v45 = vpop.f32.mrb[0].mxu0 }
 0x229   : > { %v526_v56 = vadd.f32 %v611_v44, %v525_v45  ;;  %v527_v57 = vpop.f32.mrb[1].mxu0 }
 0x22a   : > { %v528_v58 = vpop.f32.mrb[2].mxu0 }
 0x22b   : > { %541 = vst.msk [vmem:[%s229_s16] sm:$0xff] %vm540_vm1, %v526_v56  ;;  %v529_v59 = vadd.f32 %v611_v44, %v528_v58  ;;  %v530_v60 = vpop.f32.mrb[3].mxu0 }
 0x22c   : > { %v533_v61 = vpop.f32.mrb[0].mxu1 }
 0x22d   : > { %542 = vst.msk [vmem:[%s229_s16 + $0x8] sm:$0xff] %vm540_vm1, %v529_v59  ;;  %v534_v62 = vadd.f32 %v611_v44, %v533_v61  ;;  %v535_v63 = vpop.f32.mrb[1].mxu1 }
 0x22e   : > { %v536_v0 = vpop.f32.mrb[2].mxu1 }
 0x22f   : > { %543 = vst.msk [vmem:[%s229_s16 + $0x10] sm:$0xff] %vm540_vm1, %v534_v62  ;;  %v537_v1 = vadd.f32 %v611_v44, %v536_v0  ;;  %v538_v2 = vpop.f32.mrb[3].mxu1 }
 0x231   : > { %544 = vst.msk [vmem:[%s229_s16 + $0x18] sm:$0xff] %vm540_vm1, %v537_v1 }
 0x232 PF: > { %s15_s18 = sadd.s32 1, %s700_s18  }
 0x233   : > { %p12_p4 = scmp.ge.s32.totalorder %s15_s18, 4  }
 0x235   :  { %14 = sbr.rel (!%p12_p4) target bundleno = 1 (0x1), region = 70 }

</bundles_post_ra>
